<compile_context>
chip_gen: v6e
topology: v6e:2x2x1
jax: 0.10.0
libtpu: 0.0.40
codegen_flags: <defaults>
</compile_context>

<pallas_src>
import jax
import jax.numpy as jnp
from jax.experimental import pallas as pl
from jax.experimental.pallas import tpu as pltpu


NUM_IN = 60          # model input features
NUM_IN_PAD = 64      # zero-padded K for lane-aligned bf16 rows (128 B/row)
H1 = 120
H2 = 120
H3 = 30
NUM_OUT = 1


def _round_up(v, m):
    return ((v + m - 1) // m) * m


def mlp_kernel(x_ref,
               w1_ref, b1_ref,
               w2_ref, b2_ref,
               w3_ref, b3_ref,
               w4_ref, b4_ref,
               o_ref):
    # x streams from HBM as bf16 (halves the dominant HBM traffic); all math
    # accumulates in f32 (weights/biases are f32, so the dots promote to f32).
    x = x_ref[...]                                                  # (tb, 64) bf16

    h = jnp.dot(x, w1_ref[...], preferred_element_type=jnp.float32) + b1_ref[...]
    h = jnp.maximum(h, 0.0)

    h = jnp.dot(h, w2_ref[...], preferred_element_type=jnp.float32) + b2_ref[...]
    h = jnp.maximum(h, 0.0)

    h = jnp.dot(h, w3_ref[...], preferred_element_type=jnp.float32) + b3_ref[...]
    h = jnp.maximum(h, 0.0)

    # Final layer has N=1: a (tb,30)x(30,1) matmul would use 1 MXU column and
    # pay result-FIFO latency for almost no work -> VPU multiply + XLU reduce.
    y = jnp.sum(h * w4_ref[...], axis=-1, keepdims=True) + b4_ref[...]  # (tb, 1)
    o_ref[...] = jax.nn.sigmoid(y).astype(o_ref.dtype)


def mlp_forward(x, params, *, batch_tile=None):
    """Forward pass. x: (B, ...) with trailing dims flattening to 60 features.

    Returns (B, 1) float32."""
    B = x.shape[0]
    x = x.reshape(B, -1)                     # nn.Flatten
    assert x.shape[1] == NUM_IN

    (w1, b1), (w2, b2), (w3, b3), (w4, b4) = params

    # Batch tile: target ~512 rows (near HBM roofline) but keep >=2 grid steps
    # when the batch allows it (DMA pipelining + v7x dual-TC sharding); always
    # a multiple of 16 so the bf16 block packs cleanly on sublanes.
    tb = batch_tile
    if tb is None:
        tb = min(512, max(16, _round_up(B, 16) // 2))
        tb = (tb // 16) * 16
    assert tb % 16 == 0, "batch_tile must be a multiple of 16"

    B_pad = _round_up(B, tb)                 # handles B not divisible by tb

    # Host-side prep: pad batch to a tile multiple, pad K 60->64, stream x as
    # bf16. Weights are tiny, stay f32, and are fetched once (resident blocks).
    x_p = jnp.zeros((B_pad, NUM_IN_PAD), jnp.bfloat16)
    x_p = x_p.at[:B, :NUM_IN].set(x.astype(jnp.bfloat16))
    w1_p = jnp.pad(w1.astype(jnp.float32), ((0, NUM_IN_PAD - NUM_IN), (0, 0)))
    w4_row = w4.astype(jnp.float32).reshape(1, H3)    # (1, 30) for the VPU reduce

    def full_spec(arr):
        ndim = arr.ndim
        return pl.BlockSpec(arr.shape, lambda i: (0,) * ndim)

    grid = (B_pad // tb,)
    out = pl.pallas_call(
        mlp_kernel,
        out_shape=jax.ShapeDtypeStruct((B_pad, NUM_OUT), jnp.float32),
        grid_spec=pltpu.PrefetchScalarGridSpec(
            num_scalar_prefetch=0,
            grid=grid,
            in_specs=[
                pl.BlockSpec((tb, NUM_IN_PAD), lambda i: (i, 0)),
                full_spec(w1_p), full_spec(b1),
                full_spec(w2), full_spec(b2),
                full_spec(w3), full_spec(b3),
                full_spec(w4_row), full_spec(b4),
            ],
            out_specs=pl.BlockSpec((tb, NUM_OUT), lambda i: (i, 0)),
        ),
        compiler_params=pltpu.CompilerParams(
            dimension_semantics=("parallel",)),
    )(x_p, w1_p, b1, w2, b2, w3, b3, w4_row, b4)
    return out[:B]


def init_params(key):
    """Deterministic init mimicking nn.Linear default (uniform +-1/sqrt(fan_in)).

    Weights in (in, out) layout; biases as (1, out)."""
    dims = [(NUM_IN, H1), (H1, H2), (H2, H3), (H3, NUM_OUT)]
    params = []
    for (fan_in, fan_out) in dims:
        key, kw, kb = jax.random.split(key, 3)
        bound = 1.0 / jnp.sqrt(fan_in)
        w = jax.random.uniform(kw, (fan_in, fan_out), jnp.float32, -bound, bound)
        b = jax.random.uniform(kb, (1, fan_out), jnp.float32, -bound, bound)
        params.append((w, b))
    return params


def reference_forward(x, params):
    h = x.reshape(x.shape[0], -1)
    for i, (w, b) in enumerate(params):
        h = h @ w + b
        if i < len(params) - 1:
            h = jnp.maximum(h, 0.0)
    return jax.nn.sigmoid(h)


if __name__ == "__main__":
    key = jax.random.PRNGKey(0)
    key, kx = jax.random.split(key)

    # Small batch of 60-feature vectors; B is deliberately NOT a multiple of
    # the tile so the pad-and-slice path is exercised, and the default tile
    # gives a multi-step (pipelined) grid.
    B = 200
    x = jax.random.normal(kx, (B, NUM_IN), jnp.float32)

    params = init_params(key)

    y = mlp_forward(x, params)
    y = jax.block_until_ready(y)

    # Reference uses the same bf16-rounded x that the kernel streams from HBM;
    # everything else is f32, so the results should match closely.
    x_ref = x.astype(jnp.bfloat16).astype(jnp.float32)
    y_ref = reference_forward(x_ref, params)

    assert y.shape == (B, NUM_OUT)
    assert jnp.allclose(y, y_ref, atol=1e-4, rtol=1e-4), \
        float(jnp.max(jnp.abs(y - y_ref)))

    print("KERNEL_OK")
</pallas_src>

<mosaic_0001>
module attributes {stable_mosaic.version = 11 : i64} {
  func.func @mlp_kernel(%arg0: i32, %arg1: memref<96x64xbf16, #tpu.memory_space<vmem>>, %arg2: memref<64x120xf32, #tpu.memory_space<vmem>>, %arg3: memref<1x120xf32, #tpu.memory_space<vmem>>, %arg4: memref<120x120xf32, #tpu.memory_space<vmem>>, %arg5: memref<1x120xf32, #tpu.memory_space<vmem>>, %arg6: memref<120x30xf32, #tpu.memory_space<vmem>>, %arg7: memref<1x30xf32, #tpu.memory_space<vmem>>, %arg8: memref<1x30xf32, #tpu.memory_space<vmem>>, %arg9: memref<1x1xf32, #tpu.memory_space<vmem>>, %arg10: memref<96x1xf32, #tpu.memory_space<vmem>>) attributes {dimension_semantics = [#tpu.dimension_semantics<parallel>], iteration_bounds = array<i64: 3>, scalar_prefetch = 0 : i64, scratch_operands = 0 : i64, tpu.core_type = #tpu.core_type<tc>, window_params = [{transform_indices = @transform_0, window_bounds = array<i64: 96, 64>}, {pipeline_mode = #tpu.pipeline_mode<synchronous>, transform_indices = @transform_1, window_bounds = array<i64: 64, 120>}, {pipeline_mode = #tpu.pipeline_mode<synchronous>, transform_indices = @transform_2, window_bounds = array<i64: 1, 120>}, {pipeline_mode = #tpu.pipeline_mode<synchronous>, transform_indices = @transform_3, window_bounds = array<i64: 120, 120>}, {pipeline_mode = #tpu.pipeline_mode<synchronous>, transform_indices = @transform_4, window_bounds = array<i64: 1, 120>}, {pipeline_mode = #tpu.pipeline_mode<synchronous>, transform_indices = @transform_5, window_bounds = array<i64: 120, 30>}, {pipeline_mode = #tpu.pipeline_mode<synchronous>, transform_indices = @transform_6, window_bounds = array<i64: 1, 30>}, {pipeline_mode = #tpu.pipeline_mode<synchronous>, transform_indices = @transform_7, window_bounds = array<i64: 1, 30>}, {pipeline_mode = #tpu.pipeline_mode<synchronous>, transform_indices = @transform_8, window_bounds = array<i64: 1, 1>}, {transform_indices = @transform_9, window_bounds = array<i64: 96, 1>}]} {
    %c0 = arith.constant 0 : index
    %c0_0 = arith.constant 0 : index
    %0 = vector.load %arg1[%c0, %c0_0] : memref<96x64xbf16, #tpu.memory_space<vmem>>, vector<96x64xbf16>
    %c0_1 = arith.constant 0 : index
    %c0_2 = arith.constant 0 : index
    %1 = vector.load %arg2[%c0_1, %c0_2] : memref<64x120xf32, #tpu.memory_space<vmem>>, vector<64x120xf32>
    %cst = arith.constant dense<0.000000e+00> : vector<96x120xf32>
    %2 = tpu.matmul %0, %1, %cst {dimension_numbers = #tpu.dot_dimension_numbers<[1], [0], [0], [1], [0, 0, 1, 1], [], []>} : vector<96x64xbf16>, vector<64x120xf32>, vector<96x120xf32> -> vector<96x120xf32>
    %c0_3 = arith.constant 0 : index
    %c0_4 = arith.constant 0 : index
    %3 = vector.load %arg3[%c0_3, %c0_4] : memref<1x120xf32, #tpu.memory_space<vmem>>, vector<1x120xf32>
    %4 = vector.broadcast %3 : vector<1x120xf32> to vector<96x120xf32>
    %5 = arith.addf %2, %4 : vector<96x120xf32>
    %cst_5 = arith.constant 0.000000e+00 : f32
    %6 = vector.broadcast %cst_5 : f32 to vector<96x120xf32>
    %7 = arith.maximumf %5, %6 : vector<96x120xf32>
    %c0_6 = arith.constant 0 : index
    %c0_7 = arith.constant 0 : index
    %8 = vector.load %arg4[%c0_6, %c0_7] : memref<120x120xf32, #tpu.memory_space<vmem>>, vector<120x120xf32>
    %cst_8 = arith.constant dense<0.000000e+00> : vector<96x120xf32>
    %9 = tpu.matmul %7, %8, %cst_8 {dimension_numbers = #tpu.dot_dimension_numbers<[1], [0], [0], [1], [0, 0, 1, 1], [], []>} : vector<96x120xf32>, vector<120x120xf32>, vector<96x120xf32> -> vector<96x120xf32>
    %c0_9 = arith.constant 0 : index
    %c0_10 = arith.constant 0 : index
    %10 = vector.load %arg5[%c0_9, %c0_10] : memref<1x120xf32, #tpu.memory_space<vmem>>, vector<1x120xf32>
    %11 = vector.broadcast %10 : vector<1x120xf32> to vector<96x120xf32>
    %12 = arith.addf %9, %11 : vector<96x120xf32>
    %cst_11 = arith.constant 0.000000e+00 : f32
    %13 = vector.broadcast %cst_11 : f32 to vector<96x120xf32>
    %14 = arith.maximumf %12, %13 : vector<96x120xf32>
    %c0_12 = arith.constant 0 : index
    %c0_13 = arith.constant 0 : index
    %15 = vector.load %arg6[%c0_12, %c0_13] : memref<120x30xf32, #tpu.memory_space<vmem>>, vector<120x30xf32>
    %cst_14 = arith.constant dense<0.000000e+00> : vector<96x30xf32>
    %16 = tpu.matmul %14, %15, %cst_14 {dimension_numbers = #tpu.dot_dimension_numbers<[1], [0], [0], [1], [0, 0, 1, 1], [], []>} : vector<96x120xf32>, vector<120x30xf32>, vector<96x30xf32> -> vector<96x30xf32>
    %c0_15 = arith.constant 0 : index
    %c0_16 = arith.constant 0 : index
    %17 = vector.load %arg7[%c0_15, %c0_16] : memref<1x30xf32, #tpu.memory_space<vmem>>, vector<1x30xf32>
    %18 = vector.broadcast %17 : vector<1x30xf32> to vector<96x30xf32>
    %19 = arith.addf %16, %18 : vector<96x30xf32>
    %cst_17 = arith.constant 0.000000e+00 : f32
    %20 = vector.broadcast %cst_17 : f32 to vector<96x30xf32>
    %21 = arith.maximumf %19, %20 : vector<96x30xf32>
    %c0_18 = arith.constant 0 : index
    %c0_19 = arith.constant 0 : index
    %22 = vector.load %arg8[%c0_18, %c0_19] : memref<1x30xf32, #tpu.memory_space<vmem>>, vector<1x30xf32>
    %23 = vector.broadcast %22 : vector<1x30xf32> to vector<96x30xf32>
    %24 = arith.mulf %21, %23 : vector<96x30xf32>
    %cst_20 = arith.constant dense<0.000000e+00> : vector<96xf32>
    %25 = vector.multi_reduction <add>, %24, %cst_20 [1] : vector<96x30xf32> to vector<96xf32>
    %26 = vector.shape_cast %25 : vector<96xf32> to vector<96x1xf32>
    %c0_21 = arith.constant 0 : index
    %c0_22 = arith.constant 0 : index
    %27 = vector.load %arg9[%c0_21, %c0_22] : memref<1x1xf32, #tpu.memory_space<vmem>>, vector<1x1xf32>
    %28 = vector.broadcast %27 : vector<1x1xf32> to vector<96x1xf32>
    %29 = arith.addf %26, %28 : vector<96x1xf32>
    %30 = arith.negf %29 : vector<96x1xf32>
    %31 = math.exp %30 : vector<96x1xf32>
    %cst_23 = arith.constant 1.000000e+00 : f32
    %32 = vector.broadcast %cst_23 : f32 to vector<96x1xf32>
    %33 = arith.addf %32, %31 : vector<96x1xf32>
    %34 = arith.divf %32, %33 : vector<96x1xf32>
    %c0_24 = arith.constant 0 : index
    %c0_25 = arith.constant 0 : index
    %35 = vector.load %arg10[%c0_24, %c0_25] : memref<96x1xf32, #tpu.memory_space<vmem>>, vector<96x1xf32>
    tpu.vector_store %arg10[%c0_24, %c0_25], %34 {strides = array<i32>} : memref<96x1xf32, #tpu.memory_space<vmem>>, vector<96x1xf32>,
    return
  }
  func.func @transform_0(%arg0: i32) -> (i32, i32) {
    %c0_i32 = arith.constant 0 : i32
    %c0_i32_0 = arith.constant 0 : i32
    return %arg0, %c0_i32 : i32, i32
  }
  func.func @transform_1(%arg0: i32) -> (i32, i32) {
    %c0_i32 = arith.constant 0 : i32
    %c0_i32_0 = arith.constant 0 : i32
    %c0_i32_1 = arith.constant 0 : i32
    return %c0_i32, %c0_i32_0 : i32, i32
  }
  func.func @transform_2(%arg0: i32) -> (i32, i32) {
    %c0_i32 = arith.constant 0 : i32
    %c0_i32_0 = arith.constant 0 : i32
    %c0_i32_1 = arith.constant 0 : i32
    return %c0_i32, %c0_i32_0 : i32, i32
  }
  func.func @transform_3(%arg0: i32) -> (i32, i32) {
    %c0_i32 = arith.constant 0 : i32
    %c0_i32_0 = arith.constant 0 : i32
    %c0_i32_1 = arith.constant 0 : i32
    return %c0_i32, %c0_i32_0 : i32, i32
  }
  func.func @transform_4(%arg0: i32) -> (i32, i32) {
    %c0_i32 = arith.constant 0 : i32
    %c0_i32_0 = arith.constant 0 : i32
    %c0_i32_1 = arith.constant 0 : i32
    return %c0_i32, %c0_i32_0 : i32, i32
  }
  func.func @transform_5(%arg0: i32) -> (i32, i32) {
    %c0_i32 = arith.constant 0 : i32
    %c0_i32_0 = arith.constant 0 : i32
    %c0_i32_1 = arith.constant 0 : i32
    return %c0_i32, %c0_i32_0 : i32, i32
  }
  func.func @transform_6(%arg0: i32) -> (i32, i32) {
    %c0_i32 = arith.constant 0 : i32
    %c0_i32_0 = arith.constant 0 : i32
    %c0_i32_1 = arith.constant 0 : i32
    return %c0_i32, %c0_i32_0 : i32, i32
  }
  func.func @transform_7(%arg0: i32) -> (i32, i32) {
    %c0_i32 = arith.constant 0 : i32
    %c0_i32_0 = arith.constant 0 : i32
    %c0_i32_1 = arith.constant 0 : i32
    return %c0_i32, %c0_i32_0 : i32, i32
  }
  func.func @transform_8(%arg0: i32) -> (i32, i32) {
    %c0_i32 = arith.constant 0 : i32
    %c0_i32_0 = arith.constant 0 : i32
    %c0_i32_1 = arith.constant 0 : i32
    return %c0_i32, %c0_i32_0 : i32, i32
  }
  func.func @transform_9(%arg0: i32) -> (i32, i32) {
    %c0_i32 = arith.constant 0 : i32
    %c0_i32_0 = arith.constant 0 : i32
    return %arg0, %c0_i32 : i32, i32
  }
}

</mosaic_0001>

<bundles_post_ra>
// kernel: tpu_custom_call.1
= control target key start
LH: loop header
LB: loop body
LE: loop exit
PB: predicated region body
PF: predicated region fallthrough
CT: control target
= control target key end

     0   :  { %s1554_s11 = smov 0   ;;  %s1839_s0 = inlined_call_operand.vmem [shape: bf16[288,64], index: 0, kind: input, shape index: {}]   ;;  %s1840_s1 = inlined_call_operand.vmem [shape: f32[64,120], index: 1, kind: input, shape index: {}]   ;;  %s1841_s2 = inlined_call_operand.vmem [shape: f32[1,120], index: 2, kind: input, shape index: {}]   ;;  %s1842_s3 = inlined_call_operand.vmem [shape: f32[120,120], index: 3, kind: input, shape index: {}]   ;;  %s1843_s4 = inlined_call_operand.vmem [shape: f32[1,120], index: 4, kind: input, shape index: {}]   ;;  %s1844_s5 = inlined_call_operand.vmem [shape: f32[120,30], index: 5, kind: input, shape index: {}]   ;;  %s1845_s6 = inlined_call_operand.vmem [shape: f32[1,30], index: 6, kind: input, shape index: {}]   ;;  %s1846_s7 = inlined_call_operand.vmem [shape: f32[1,30], index: 7, kind: input, shape index: {}]   ;;  %s1847_s8 = inlined_call_operand.<no memory space> [shape: f32[1,1], index: 8, kind: input, shape index: {}]   ;;  %s1848_s9 = inlined_call_operand.vmem [shape: f32[288,1], index: 9, kind: output, shape index: {}]  }
   0x1   :  { %v14_v0 = vstv %s1847_s8 }
   0x2   :  { %15 = vst [vmem:[#allocation2] sm:$0x1] %v14_v0 }
   0x3 LB: > { %s1147_s12 = sadd.s32 4294967295, %s1499_s11   ;;  %p1151_p0 = scmp.ge.s32.totalorder %s1499_s11, 1  ;;  %s1499_s11 = sphi %s1554_s11, %s21_s11  }
   0x4   : > { %p290_p1 = scmp.lt.s32.totalorder %s1499_s11, 4 }
   0x6   : > { %p291_p2 = pnand %p1151_p0, %p290_p1 }
   0x7   : > { %s326_s16 = smul.u32 (!%p291_p2), 12, %s1147_s12 }
   0x8   : > { %294 = sbr.rel (%p291_p2) target bundleno = 831 (0x33f), region = 56 }
   0x9   : > { %p327_p3 = scmp.lt.s32.totalorder (!%p291_p2), %s326_s16, 35 }
   0xd   : > { %v358_v1 = vld [vmem:[%s1840_s1 + $0x38] sm:$0xff]  ;;  %v357_v2 = vld [vmem:[%s1840_s1 + $0x30] sm:$0xff]  ;;  %v356_v3 = vld [vmem:[%s1840_s1 + $0x28] sm:$0xff]  ;;  %s1850_s16 = smov (!%p327_p3, %s326_s16), 35  ;;  %vm396_vm0 = vcmask 523264   ;;  %vm562_vm1 = vcmask 982016  }
   0xe   : > { %1277 = vmatprep.subr.mxu0 %v358_v1  ;;  %v554_v4 = vld [vmem:[%s1842_s3 + $0x70] sm:$0xff]  ;;  %v553_v5 = vld [vmem:[%s1842_s3 + $0x68] sm:$0xff]  ;;  %v355_v6 = vld [vmem:[%s1840_s1 + $0x20] sm:$0xff]  ;;  %s1152_s29 = sshll.u32 %s1850_s16, 2  ;;  %vm950_vm2 = vcmask 244736   ;;  %s1153_s21 = sshll.u32 %s1850_s16, 3 }
   0xf   : > { %1278 = vmatpush3.msra.mxu0 %v358_v1  ;;  %1305 = vmatprep.subr.mxu1 %v554_v4  ;;  %v552_v7 = vld [vmem:[%s1842_s3 + $0x60] sm:$0xff]  ;;  %v354_v8 = vld [vmem:[%s1840_s1 + $0x18] sm:$0xff]  ;;  %v353_v10 = vld [vmem:[%s1840_s1 + $0x10] sm:$0xff]  ;;  %s1598_s15 = scalar_lea.vmem %s1839_s0, %s1152_s29  ;;  %s1810_s24 = scalar_lea.vmem %s1848_s9, %s1153_s21  ;;  %vm1078_vm3 = vcmask 7168  }
  0x10   : > { %1279 = vmatprep.subr.mxu0 %v357_v2  ;;  %1306 = vmatpush3.msra.mxu1 %v554_v4  ;;  %v551_v9 = vld [vmem:[%s1842_s3 + $0x58] sm:$0xff]  ;;  %v352_v11 = vld [vmem:[%s1840_s1 + $0x8] sm:$0xff]  ;;  %v1439_v12 = vld [vmem:[%s1598_s15] sm:$0xff]  }
  0x11   : > { %1280 = vmatpush3.msra.mxu0 %v357_v2  ;;  %1307 = vmatprep.subr.mxu1 %v553_v5  ;;  %v550_v13 = vld [vmem:[%s1842_s3 + $0x50] sm:$0xff]  ;;  %v351_v14 = vld [vmem:[%s1840_s1] sm:$0xff]  ;;  %v549_v15 = vld [vmem:[%s1842_s3 + $0x48] sm:$0xff] }
  0x12   : > { %1281 = vmatprep.subr.mxu0 %v356_v3  ;;  %1308 = vmatpush3.msra.mxu1 %v553_v5  ;;  %v548_v16 = vld [vmem:[%s1842_s3 + $0x40] sm:$0xff]  ;;  %v1440_v17 = vld [vmem:[%s1598_s15 + $0x8] sm:$0xff]   ;;  %v1441_v18 = vld [vmem:[%s1598_s15 + $0x10] sm:$0xff]  }
  0x13   : > { %1282 = vmatpush3.msra.mxu0 %v356_v3  ;;  %1309 = vmatprep.subr.mxu1 %v552_v7  ;;  %v547_v19 = vld [vmem:[%s1842_s3 + $0x38] sm:$0xff]  ;;  %v546_v20 = vld [vmem:[%s1842_s3 + $0x30] sm:$0xff]  ;;  %v545_v21 = vld [vmem:[%s1842_s3 + $0x28] sm:$0xff] }
  0x14   : > { %1283 = vmatprep.subr.mxu0 %v355_v6  ;;  %1310 = vmatpush3.msra.mxu1 %v552_v7  ;;  %v1442_v22 = vld [vmem:[%s1598_s15 + $0x18] sm:$0xff]   ;;  %v1443_v23 = vld [vmem:[%s1598_s15 + $0x20] sm:$0xff]   ;;  %v1444_v24 = vld [vmem:[%s1598_s15 + $0x28] sm:$0xff]  }
  0x15   : > { %1284 = vmatpush3.msra.mxu0 %v355_v6  ;;  %1311 = vmatprep.subr.mxu1 %v551_v9  ;;  %v544_v25 = vld [vmem:[%s1842_s3 + $0x20] sm:$0xff]  ;;  %v543_v26 = vld [vmem:[%s1842_s3 + $0x18] sm:$0xff]  ;;  %v542_v27 = vld [vmem:[%s1842_s3 + $0x10] sm:$0xff] }
  0x16   : > { %1285 = vmatprep.subr.mxu0 %v354_v8  ;;  %1293 = vmatprep.mubr.msk.bf16.mxu0 %vm396_vm0, %v1439_v12  ;;  %v541_v28 = vld [vmem:[%s1842_s3 + $0x8] sm:$0xff]  ;;  %v540_v29 = vld [vmem:[%s1842_s3] sm:$0xff]  ;;  %v750_v30 = vld [vmem:[%s1844_s5 + $0x70] sm:$0xff] }
  0x17   : > { %1286 = vmatpush3.msra.mxu0 %v354_v8  ;;  %1312 = vmatpush3.msra.mxu1 %v551_v9  ;;  %v749_v31 = vld [vmem:[%s1844_s5 + $0x68] sm:$0xff]  ;;  %v748_v32 = vld [vmem:[%s1844_s5 + $0x60] sm:$0xff]  ;;  %v1663_v33 = vld [vmem:[%s1844_s5 + $0x58] sm:$0xff] }
  0x18   : > { %1287 = vmatprep.subr.mxu0 %v353_v10  ;;  %1313 = vmatprep.subr.mxu1 %v550_v13  ;;  %v1668_v34 = vld [vmem:[%s1844_s5 + $0x50] sm:$0xff]  ;;  %v1675_v35 = vld [vmem:[%s1844_s5 + $0x48] sm:$0xff]  ;;  %v1682_v36 = vld [vmem:[%s1844_s5 + $0x40] sm:$0xff] }
  0x19   : > { %1288 = vmatpush3.msra.mxu0 %v353_v10  ;;  %1314 = vmatpush3.msra.mxu1 %v550_v13  ;;  %v1689_v37 = vld [vmem:[%s1844_s5 + $0x38] sm:$0xff]  ;;  %v1696_v38 = vld [vmem:[%s1844_s5 + $0x30] sm:$0xff]  ;;  %v1703_v39 = vld [vmem:[%s1844_s5 + $0x28] sm:$0xff] }
  0x1a   : > { %1289 = vmatprep.subr.mxu0 %v352_v11  ;;  %1315 = vmatprep.subr.mxu1 %v549_v15  ;;  %v1710_v40 = vld [vmem:[%s1844_s5 + $0x20] sm:$0xff] }
  0x1b   : > { %1290 = vmatpush3.msra.mxu0 %v352_v11  ;;  %1316 = vmatpush3.msra.mxu1 %v549_v15  ;;  %v1154_v42 = vld [vmem:[%s1841_s2] ss:$0 sm:$0xff]  ;;  %v738_v15 = vld [vmem:[%s1844_s5 + $0x10] sm:$0xff] }
  0x1c   : > { %1291 = vmatprep.subr.mxu0 %v351_v14  ;;  %1317 = vmatprep.subr.mxu1 %v548_v16 }
  0x1d   : > { %1292 = vmatpush3.msra.mxu0 %v351_v14  ;;  %1318 = vmatpush3.msra.mxu1 %v548_v16  ;;  %v739_v14 = vld [vmem:[%s1844_s5 + $0x18] sm:$0xff]  ;;  %v737_v16 = vld [vmem:[%s1844_s5 + $0x8] sm:$0xff] }
  0x1e   : > { %1294 = vmatmul.mubr.msk.bf16.vlgmr.msra.gmra.mxu0 %vm396_vm0, %v1440_v17  ;;  %1319 = vmatprep.subr.mxu1 %v547_v19  ;;  %v736_v17 = vld [vmem:[%s1844_s5] sm:$0xff] }
  0x1f   : > { %1297 = vmatprep.mubr.msk.bf16.mxu0 %vm396_vm0, %v1441_v18  ;;  %1320 = vmatpush3.msra.mxu1 %v547_v19  ;;  %v1167_v18 = vld [vmem:[%s1843_s4] ss:$0 sm:$0xff] }
  0x20   : > { %1321 = vmatprep.subr.mxu1 %v546_v20  ;;  %1353 = vmatprep.subr.mxu0 %v750_v30 }
  0x21   : > { %1322 = vmatpush3.msra.mxu1 %v546_v20  ;;  %1354 = vmatpush3.msra.mxu0 %v750_v30 }
  0x22   : > { %1323 = vmatprep.subr.mxu1 %v545_v21  ;;  %1355 = vmatprep.subr.mxu0 %v749_v31 }
  0x23   : > { %1324 = vmatpush3.msra.mxu1 %v545_v21  ;;  %1356 = vmatpush3.msra.mxu0 %v749_v31 }
  0x24   : > { %1325 = vmatprep.subr.mxu1 %v544_v25  ;;  %1357 = vmatprep.subr.mxu0 %v748_v32 }
  0x25   : > { %1326 = vmatpush3.msra.mxu1 %v544_v25  ;;  %1358 = vmatpush3.msra.mxu0 %v748_v32 }
  0x26   : > { %1298 = vmatmul.mubr.msk.bf16.gmra.mxu0 %vm396_vm0, %v1442_v22  ;;  %1327 = vmatprep.subr.mxu1 %v543_v26 }
  0x27   : > { %1301 = vmatprep.mubr.msk.bf16.mxu0 %vm396_vm0, %v1443_v23  ;;  %1328 = vmatpush3.msra.mxu1 %v543_v26 }
  0x28   : > { %1329 = vmatprep.subr.mxu1 %v542_v27  ;;  %1359 = vmatprep.subr.mxu0 %v1663_v33 }
  0x29   : > { %1330 = vmatpush3.msra.mxu1 %v542_v27  ;;  %1360 = vmatpush3.msra.mxu0 %v1663_v33 }
  0x2a   : > { %1331 = vmatprep.subr.mxu1 %v541_v28  ;;  %1361 = vmatprep.subr.mxu0 %v1668_v34 }
  0x2b   : > { %1332 = vmatpush3.msra.mxu1 %v541_v28  ;;  %1362 = vmatpush3.msra.mxu0 %v1668_v34 }
  0x2c   : > { %1333 = vmatprep.subr.mxu1 %v540_v29  ;;  %1363 = vmatprep.subr.mxu0 %v1675_v35 }
  0x2d   : > { %1334 = vmatpush3.msra.mxu1 %v540_v29  ;;  %1364 = vmatpush3.msra.mxu0 %v1675_v35 }
  0x2e   : > { %1302 = vmatmul.mubr.msk.bf16.gmra.mxu0 %vm396_vm0, %v1444_v24  ;;  %1401 = vmatprep.subr.mxu1 %v750_v30 }
  0x2f   : > { %1365 = vmatprep.subr.mxu0 %v1682_v36 }
  0x30   : > { %1366 = vmatpush3.msra.mxu0 %v1682_v36 }
  0x31   : > { %1367 = vmatprep.subr.mxu0 %v1689_v37 }
  0x32   : > { %1368 = vmatpush3.msra.mxu0 %v1689_v37 }
  0x33   : > { %1369 = vmatprep.subr.mxu0 %v1696_v38 }
  0x34   : > { %1370 = vmatpush3.msra.mxu0 %v1696_v38 }
  0x35   : > { %1371 = vmatprep.subr.mxu0 %v1703_v39 }
  0x36   : > { %1372 = vmatpush3.msra.mxu0 %v1703_v39 }
  0x37   : > { %1373 = vmatprep.subr.mxu0 %v1710_v40 }
  0x38   : > { %1374 = vmatpush3.msra.mxu0 %v1710_v40 }
  0x39   : > { %1375 = vmatprep.subr.mxu0 %v739_v14 }
  0x3a   : > { %1376 = vmatpush3.msra.mxu0 %v739_v14 }
  0x3b   : > { %1377 = vmatprep.subr.mxu0 %v738_v15 }
  0x3c   : > { %1378 = vmatpush3.msra.mxu0 %v738_v15 }
  0x3d   : > { %1379 = vmatprep.subr.mxu0 %v737_v16 }
  0x3e   : > { %1380 = vmatpush3.msra.mxu0 %v737_v16 }
  0x3f   : > { %1381 = vmatprep.subr.mxu0 %v736_v17 }
  0x40   : > { %1382 = vmatpush3.msra.mxu0 %v736_v17 }
  0xde   : > { %v1295_v41 = vpop.f32.mrf.mxu0 }
  0xdf   : > { %v490_v47 = vadd.f32 %v1295_v41, %v1154_v42 }
  0xe0   : > { %v481_v43 = vpop.f32.mrf.mxu0 }
  0xe1   : > { %v482_v44 = vadd.f32 %v1154_v42, %v481_v43  ;;  %v530_v53 = vmax.f32 %v490_v47, 0.0 }
  0xe2   : > { %v1296_v45 = vpop.f32.mrf.mxu0 }
  0xe3   : > { %v528_v46 = vmax.f32 %v482_v44, 0.0  ;;  %v493_v51 = vadd.f32 %v1296_v45, %v1154_v42 }
  0xe4   : > { %v484_v48 = vpop.f32.mrf.mxu0 }
  0xe5   : > { %v485_v49 = vadd.f32 %v1154_v42, %v484_v48  ;;  %1335 = vmatprep.mubr.msk.f32.mxu1 %vm562_vm1, %v528_v46  ;;  %v531_v57 = vmax.f32 %v493_v51, 0.0 }
  0xe6   : > { %v1299_v50 = vpop.f32.mrf.mxu0 }
  0xe7   : > { %v529_v52 = vmax.f32 %v485_v49, 0.0  ;;  %v506_v59 = vadd.f32 %v1299_v50, %v1154_v42 }
  0xe8   : > { %v497_v54 = vpop.f32.mrf.mxu0 }
  0xe9   : > { %v498_v55 = vadd.f32 %v1154_v42, %v497_v54  ;;  %1336 = vmatmul.mubr.msk.f32.vlgmr.msra.gmra.mxu1 %vm562_vm1, %v529_v52  ;;  %v534_v1 = vmax.f32 %v506_v59, 0.0  ;;  %v1780_v59 = vld [vmem:[%s1846_s7] ss:$0 sm:$0xff] }
  0xea   : > { %v1300_v56 = vpop.f32.mrf.mxu0  ;;  %1338 = vmatprep.mubr.msk.f32.mxu1 %vm562_vm1, %v530_v53  ;;  %1416 = vmatpush3.msra.mxu1 %v750_v30 }
  0xeb   : > { %v532_v58 = vmax.f32 %v498_v55, 0.0  ;;  %1402 = vmatprep.subr.mxu1 %v749_v31  ;;  %v509_v63 = vadd.f32 %v1300_v56, %v1154_v42  ;;  %v1180_v55 = vld [vmem:[%s1845_s6] ss:$0 sm:$0xff] }
  0xec   : > { %v500_v60 = vpop.f32.mrf.mxu0  ;;  %1417 = vmatpush3.msra.mxu1 %v749_v31 }
  0xed   : > { %v501_v61 = vadd.f32 %v1154_v42, %v500_v60  ;;  %1339 = vmatmul.mubr.msk.f32.gmra.mxu1 %vm562_vm1, %v531_v57  ;;  %1403 = vmatprep.subr.mxu1 %v748_v32  ;;  %v535_v5 = vmax.f32 %v509_v63, 0.0 }
  0xee   : > { %v1303_v62 = vpop.f32.mrf.mxu0  ;;  %1341 = vmatprep.mubr.msk.f32.mxu1 %vm562_vm1, %v532_v58  ;;  %1418 = vmatpush3.msra.mxu1 %v748_v32 }
  0xef   : > { %v533_v0 = vmax.f32 %v501_v61, 0.0  ;;  %1404 = vmatprep.subr.mxu1 %v1663_v33  ;;  %v522_v7 = vadd.f32 %v1303_v62, %v1154_v42 }
  0xf0   : > { %v513_v2 = vpop.f32.mrf.mxu0  ;;  %1419 = vmatpush3.msra.mxu1 %v1663_v33 }
  0xf1   : > { %v514_v3 = vadd.f32 %v1154_v42, %v513_v2  ;;  %1342 = vmatmul.mubr.msk.f32.gmra.mxu1 %vm562_vm1, %v533_v0  ;;  %1405 = vmatprep.subr.mxu1 %v1668_v34  ;;  %v538_v12 = vmax.f32 %v522_v7, 0.0 }
  0xf2   : > { %v1304_v4 = vpop.f32.mrf.mxu0  ;;  %1344 = vmatprep.mubr.msk.f32.mxu1 %vm562_vm1, %v534_v1  ;;  %1420 = vmatpush3.msra.mxu1 %v1668_v34 }
  0xf3   : > { %v536_v6 = vmax.f32 %v514_v3, 0.0  ;;  %1406 = vmatprep.subr.mxu1 %v1675_v35  ;;  %v525_v10 = vadd.f32 %v1304_v4, %v1154_v42 }
  0xf4   : > { %v516_v8 = vpop.f32.mrf.mxu0  ;;  %1421 = vmatpush3.msra.mxu1 %v1675_v35 }
  0xf5   : > { %v517_v9 = vadd.f32 %v1154_v42, %v516_v8  ;;  %1345 = vmatmul.mubr.msk.f32.gmra.mxu1 %vm562_vm1, %v535_v5  ;;  %1407 = vmatprep.subr.mxu1 %v1682_v36  ;;  %v539_v13 = vmax.f32 %v525_v10, 0.0 }
  0xf6   : > { %1347 = vmatprep.mubr.msk.f32.mxu1 %vm562_vm1, %v536_v6  ;;  %1422 = vmatpush3.msra.mxu1 %v1682_v36 }
  0xf7   : > { %v537_v11 = vmax.f32 %v517_v9, 0.0  ;;  %1408 = vmatprep.subr.mxu1 %v1689_v37 }
  0xf8   : > { %1423 = vmatpush3.msra.mxu1 %v1689_v37 }
  0xf9   : > { %1348 = vmatmul.mubr.msk.f32.gmra.mxu1 %vm562_vm1, %v537_v11  ;;  %1409 = vmatprep.subr.mxu1 %v1696_v38 }
  0xfa   : > { %1350 = vmatprep.mubr.msk.f32.mxu1 %vm562_vm1, %v538_v12  ;;  %1424 = vmatpush3.msra.mxu1 %v1696_v38 }
  0xfb   : > { %1410 = vmatprep.subr.mxu1 %v1703_v39 }
  0xfc   : > { %1425 = vmatpush3.msra.mxu1 %v1703_v39 }
  0xfd   : > { %1351 = vmatmul.mubr.msk.f32.gmra.mxu1 %vm562_vm1, %v539_v13  ;;  %1411 = vmatprep.subr.mxu1 %v1710_v40 }
  0xfe   : > { %1426 = vmatpush3.msra.mxu1 %v1710_v40 }
  0xff   : > { %1412 = vmatprep.subr.mxu1 %v739_v14 }
 0x100   : > { %1427 = vmatpush3.msra.mxu1 %v739_v14 }
 0x101   : > { %1413 = vmatprep.subr.mxu1 %v738_v15 }
 0x102   : > { %1428 = vmatpush3.msra.mxu1 %v738_v15 }
 0x103   : > { %1414 = vmatprep.subr.mxu1 %v737_v16 }
 0x104   : > { %1429 = vmatpush3.msra.mxu1 %v737_v16 }
 0x105   : > { %1415 = vmatprep.subr.mxu1 %v736_v17 }
 0x106   : > { %1430 = vmatpush3.msra.mxu1 %v736_v17 }
 0x1a9   : > { %v1337_v19 = vpop.f32.mrf.mxu1 }
 0x1aa   : > { %v671_v20 = vadd.f32 %v1337_v19, %v1167_v18 }
 0x1ab   : > { %v665_v21 = vpop.f32.mrf.mxu1 }
 0x1ac   : > { %v666_v22 = vadd.f32 %v1167_v18, %v665_v21  ;;  %v725_v25 = vmax.f32 %v671_v20, 0.0 }
 0x1ad   : > { %v1340_v23 = vpop.f32.mrf.mxu1 }
 0x1ae   : > { %v724_v24 = vmax.f32 %v666_v22, 0.0  ;;  %v681_v26 = vadd.f32 %v1340_v23, %v1167_v18 }
 0x1af   : > { %v675_v27 = vpop.f32.mrf.mxu1 }
 0x1b0   : > { %v676_v28 = vadd.f32 %v1167_v18, %v675_v27  ;;  %1383 = vmatprep.mubr.msk.f32.mxu0 %vm562_vm1, %v724_v24  ;;  %v727_v31 = vmax.f32 %v681_v26, 0.0 }
 0x1b1   : > { %v1343_v29 = vpop.f32.mrf.mxu1  ;;  %1384 = vmatmul.mubr.msk.f32.vlgmr.msra.gmra.mxu0 %vm562_vm1, %v725_v25 }
 0x1b2   : > { %v726_v30 = vmax.f32 %v676_v28, 0.0  ;;  %v691_v32 = vadd.f32 %v1343_v29, %v1167_v18 }
 0x1b3   : > { %v685_v33 = vpop.f32.mrf.mxu1 }
 0x1b4   : > { %v686_v34 = vadd.f32 %v1167_v18, %v685_v33  ;;  %1386 = vmatprep.mubr.msk.f32.mxu0 %vm562_vm1, %v726_v30  ;;  %v729_v37 = vmax.f32 %v691_v32, 0.0 }
 0x1b5   : > { %v1346_v35 = vpop.f32.mrf.mxu1  ;;  %1387 = vmatmul.mubr.msk.f32.gmra.mxu0 %vm562_vm1, %v727_v31 }
 0x1b6   : > { %v728_v36 = vmax.f32 %v686_v34, 0.0  ;;  %v701_v38 = vadd.f32 %v1346_v35, %v1167_v18 }
 0x1b7   : > { %v695_v39 = vpop.f32.mrf.mxu1 }
 0x1b8   : > { %v696_v40 = vadd.f32 %v1167_v18, %v695_v39  ;;  %1389 = vmatprep.mubr.msk.f32.mxu0 %vm562_vm1, %v728_v36  ;;  %v731_v43 = vmax.f32 %v701_v38, 0.0 }
 0x1b9   : > { %v1349_v41 = vpop.f32.mrf.mxu1  ;;  %1390 = vmatmul.mubr.msk.f32.gmra.mxu0 %vm562_vm1, %v729_v37 }
 0x1ba   : > { %v730_v42 = vmax.f32 %v696_v40, 0.0  ;;  %v711_v44 = vadd.f32 %v1349_v41, %v1167_v18 }
 0x1bb   : > { %v705_v45 = vpop.f32.mrf.mxu1 }
 0x1bc   : > { %v706_v46 = vadd.f32 %v1167_v18, %v705_v45  ;;  %1392 = vmatprep.mubr.msk.f32.mxu0 %vm562_vm1, %v730_v42  ;;  %v733_v49 = vmax.f32 %v711_v44, 0.0 }
 0x1bd   : > { %v1352_v47 = vpop.f32.mrf.mxu1  ;;  %1393 = vmatmul.mubr.msk.f32.gmra.mxu0 %vm562_vm1, %v731_v43 }
 0x1be   : > { %v732_v48 = vmax.f32 %v706_v46, 0.0  ;;  %v721_v50 = vadd.f32 %v1352_v47, %v1167_v18 }
 0x1bf   : > { %v715_v51 = vpop.f32.mrf.mxu1 }
 0x1c0   : > { %v716_v52 = vadd.f32 %v1167_v18, %v715_v51  ;;  %1395 = vmatprep.mubr.msk.f32.mxu0 %vm562_vm1, %v732_v48  ;;  %v735_v54 = vmax.f32 %v721_v50, 0.0 }
 0x1c1   : > { %1396 = vmatmul.mubr.msk.f32.gmra.mxu0 %vm562_vm1, %v733_v49 }
 0x1c2   : > { %v734_v53 = vmax.f32 %v716_v52, 0.0 }
 0x1c4   : > { %1398 = vmatprep.mubr.msk.f32.mxu1 %vm562_vm1, %v734_v53  ;;  %v1194_v53 = vld [vmem:[#allocation2] ss:$0 sm:$0xff] }
 0x1c5   : > { %1399 = vmatmul.mubr.msk.f32.vlgmr.msra.gmra.mxu1 %vm562_vm1, %v735_v54 }
 0x271   : > { %v1385_v56 = vpop.f32.mrf.mxu0 }
 0x272   : > { %v866_v57 = vadd.f32 %v1385_v56, %v1180_v55 }
 0x273   : > { %v860_v58 = vpop.f32.mrf.mxu0 }
 0x274   : > { %v920_v60 = vmax.f32 %v866_v57, 0.0  ;;  %v861_v61 = vadd.f32 %v1180_v55, %v860_v58 }
 0x275   : > { %v1388_v62 = vpop.f32.mrf.mxu0 }
 0x276   : > { %v919_v63 = vmax.f32 %v861_v61, 0.0  ;;  %v876_v0 = vadd.f32 %v1388_v62, %v1180_v55  ;;  %v939_v1 = vmul.f32 %v1780_v59, %v920_v60 }
 0x277   : > { %v870_v2 = vpop.f32.mrf.mxu0 }
 0x278   : > { %v922_v3 = vmax.f32 %v876_v0, 0.0  ;;  %v871_v4 = vadd.f32 %v1180_v55, %v870_v2  ;;  %v954_v5 = vsel %vm950_vm2, %v939_v1, 0.0  ;;  %v938_v6 = vmul.f32 %v1780_v59, %v919_v63 }
 0x279   : > { %955 = vadd.xlane.f32.xlu0 %v954_v5  ;;  %v1391_v7 = vpop.f32.mrf.mxu0 }
 0x27a   : > { %v921_v8 = vmax.f32 %v871_v4, 0.0  ;;  %v886_v9 = vadd.f32 %v1391_v7, %v1180_v55  ;;  %v941_v10 = vmul.f32 %v1780_v59, %v922_v3  ;;  %v951_v12 = vsel %vm950_vm2, %v938_v6, 0.0 }
 0x27b   : > { %v880_v11 = vpop.f32.mrf.mxu0 }
 0x27c   : > { %v924_v13 = vmax.f32 %v886_v9, 0.0  ;;  %v881_v14 = vadd.f32 %v1180_v55, %v880_v11  ;;  %v960_v15 = vsel %vm950_vm2, %v941_v10, 0.0  ;;  %v940_v16 = vmul.f32 %v1780_v59, %v921_v8 }
 0x27d   : > { %961 = vadd.xlane.f32.xlu1 %v960_v15  ;;  %v1394_v17 = vpop.f32.mrf.mxu0  ;;  %952 = vadd.xlane.f32.xlu0 %v951_v12 }
 0x27e   : > { %v923_v18 = vmax.f32 %v881_v14, 0.0  ;;  %v896_v19 = vadd.f32 %v1394_v17, %v1180_v55  ;;  %v957_v21 = vsel %vm950_vm2, %v940_v16, 0.0  ;;  %v943_v25 = vmul.f32 %v1780_v59, %v924_v13 }
 0x27f   : > { %v890_v20 = vpop.f32.mrf.mxu0 }
 0x280   : > { %v926_v22 = vmax.f32 %v896_v19, 0.0  ;;  %v891_v23 = vadd.f32 %v1180_v55, %v890_v20  ;;  %v942_v24 = vmul.f32 %v1780_v59, %v923_v18  ;;  %v966_v34 = vsel %vm950_vm2, %v943_v25, 0.0 }
 0x281   : > { %v1397_v26 = vpop.f32.mrf.mxu0  ;;  %958 = vadd.xlane.f32.xlu1 %v957_v21 }
 0x282   : > { %v925_v27 = vmax.f32 %v891_v23, 0.0  ;;  %v906_v28 = vadd.f32 %v1397_v26, %v1180_v55  ;;  %v963_v29 = vsel %vm950_vm2, %v942_v24, 0.0  ;;  %v945_v31 = vmul.f32 %v1780_v59, %v926_v22 }
 0x283   : > { %v900_v30 = vpop.f32.mrf.mxu0  ;;  %964 = vadd.xlane.f32.xlu0 %v963_v29 }
 0x284   : > { %v928_v32 = vmax.f32 %v906_v28, 0.0  ;;  %v901_v33 = vadd.f32 %v1180_v55, %v900_v30  ;;  %v944_v35 = vmul.f32 %v1780_v59, %v925_v27  ;;  %v972_v41 = vsel %vm950_vm2, %v945_v31, 0.0 }
 0x285   : > { %v1400_v36 = vpop.f32.mrf.mxu1  ;;  %967 = vadd.xlane.f32.xlu1 %v966_v34 }
 0x286   : > { %v927_v37 = vmax.f32 %v901_v33, 0.0  ;;  %v916_v38 = vadd.f32 %v1400_v36, %v1180_v55  ;;  %v969_v39 = vsel %vm950_vm2, %v944_v35, 0.0  ;;  %v947_v45 = vmul.f32 %v1780_v59, %v928_v32 }
 0x287   : > { %v910_v40 = vpop.f32.mrf.mxu1  ;;  %970 = vadd.xlane.f32.xlu0 %v969_v39 }
 0x288   : > { %v930_v42 = vmax.f32 %v916_v38, 0.0  ;;  %v911_v43 = vadd.f32 %v1180_v55, %v910_v40  ;;  %v946_v44 = vmul.f32 %v1780_v59, %v927_v37  ;;  %v978_v48 = vsel %vm950_vm2, %v947_v45, 0.0 }
 0x289   : > { %973 = vadd.xlane.f32.xlu1 %v972_v41 }
 0x28a   : > { %v929_v46 = vmax.f32 %v911_v43, 0.0  ;;  %v975_v47 = vsel %vm950_vm2, %v946_v44, 0.0  ;;  %v949_v50 = vmul.f32 %v1780_v59, %v930_v42 }
 0x28b   : > { %976 = vadd.xlane.f32.xlu0 %v975_v47 }
 0x28c   : > { %v948_v49 = vmul.f32 %v1780_v59, %v929_v46  ;;  %v984_v52 = vsel %vm950_vm2, %v949_v50, 0.0 }
 0x28d   : > { %979 = vadd.xlane.f32.xlu1 %v978_v48 }
 0x28e   : > { %v981_v51 = vsel %vm950_vm2, %v948_v49, 0.0 }
 0x28f   : > { %982 = vadd.xlane.f32.xlu0 %v981_v51 }
 0x291   : > { %985 = vadd.xlane.f32.xlu1 %v984_v52 }
 0x302   : > { %v956_v54 = vpop.xlane.xlu0 %955 }
 0x303   : > { %v995_v55 = vadd.f32 %v1194_v53, %v956_v54 }
 0x305   : > { %v1196_v56 = vmul.f32 -1.442695, %v995_v55 }
 0x306   : > { %v962_v57 = vpop.xlane.xlu1 %961  ;;  %v953_v58 = vpop.xlane.xlu0 %952 }
 0x307   : > { %1445 = vpow2.f32 %v1196_v56  ;;  %v997_v60 = vadd.f32 %v1194_v53, %v962_v57  ;;  %v994_v61 = vadd.f32 %v1194_v53, %v953_v58 }
 0x309   : > { %v1198_v62 = vmul.f32 -1.442695, %v997_v60  ;;  %v1195_v63 = vmul.f32 -1.442695, %v994_v61 }
 0x30a   : > { %v959_v0 = vpop.xlane.xlu1 %958 }
 0x30b   : > { %1447 = vpow2.f32 %v1198_v62  ;;  %v996_v59 = vadd.f32 %v1194_v53, %v959_v0 }
 0x30c   : > { %1449 = vpow2.f32 %v1195_v63  ;;  %v965_v1 = vpop.xlane.xlu0 %964 }
 0x30d   : > { %v1197_v2 = vmul.f32 -1.442695, %v996_v59  ;;  %v998_v3 = vadd.f32 %v1194_v53, %v965_v1 }
 0x30e   : > { %v968_v4 = vpop.xlane.xlu1 %967 }
 0x30f   : > { %1451 = vpow2.f32 %v1197_v2  ;;  %v1199_v5 = vmul.f32 -1.442695, %v998_v3  ;;  %v999_v6 = vadd.f32 %v1194_v53, %v968_v4 }
 0x310   : > { %v971_v7 = vpop.xlane.xlu0 %970 }
 0x311   : > { %1453 = vpow2.f32 %v1199_v5  ;;  %v1200_v8 = vmul.f32 -1.442695, %v999_v6  ;;  %v1000_v9 = vadd.f32 %v1194_v53, %v971_v7 }
 0x312   : > { %v974_v10 = vpop.xlane.xlu1 %973 }
 0x313   : > { %1455 = vpow2.f32 %v1200_v8  ;;  %v1201_v11 = vmul.f32 -1.442695, %v1000_v9  ;;  %v1001_v12 = vadd.f32 %v1194_v53, %v974_v10 }
 0x314   : > { %v1446_v13 = vpop.eup %1445  ;;  %v977_v14 = vpop.xlane.xlu0 %976 }
 0x315   : > { %v1043_v15 = vadd.f32 1.0, %v1446_v13  ;;  %1457 = vpow2.f32 %v1201_v11  ;;  %v1202_v16 = vmul.f32 -1.442695, %v1001_v12  ;;  %v1002_v17 = vadd.f32 %v1194_v53, %v977_v14 }
 0x316   : > { %v980_v18 = vpop.xlane.xlu1 %979 }
 0x317   : > { %1459 = vrcp.f32 %v1043_v15  ;;  %v1203_v19 = vmul.f32 -1.442695, %v1002_v17  ;;  %v1003_v20 = vadd.f32 %v1194_v53, %v980_v18 }
 0x318   : > { %v1448_v21 = vpop.eup %1447  ;;  %1461 = vpow2.f32 %v1202_v16  ;;  %v983_v22 = vpop.xlane.xlu0 %982 }
 0x319   : > { %v1450_v23 = vpop.eup %1449  ;;  %v1045_v24 = vadd.f32 1.0, %v1448_v21  ;;  %1463 = vpow2.f32 %v1203_v19  ;;  %v1204_v25 = vmul.f32 -1.442695, %v1003_v20  ;;  %v1004_v26 = vadd.f32 %v1194_v53, %v983_v22 }
 0x31a   : > { %v1042_v27 = vadd.f32 1.0, %v1450_v23  ;;  %v986_v28 = vpop.xlane.xlu1 %985 }
 0x31b   : > { %1465 = vrcp.f32 %v1045_v24  ;;  %v1205_v29 = vmul.f32 -1.442695, %v1004_v26  ;;  %v1005_v30 = vadd.f32 %v1194_v53, %v986_v28 }
 0x31c   : > { %v1452_v31 = vpop.eup %1451  ;;  %1467 = vrcp.f32 %v1042_v27 }
 0x31d   : > { %v1044_v32 = vadd.f32 1.0, %v1452_v31  ;;  %1469 = vpow2.f32 %v1204_v25  ;;  %v1206_v33 = vmul.f32 -1.442695, %v1005_v30 }
 0x31e   : > { %v1454_v34 = vpop.eup %1453  ;;  %1471 = vpow2.f32 %v1205_v29 }
 0x31f   : > { %1473 = vrcp.f32 %v1044_v32  ;;  %v1046_v35 = vadd.f32 1.0, %v1454_v34 }
 0x320   : > { %v1456_v36 = vpop.eup %1455  ;;  %1475 = vpow2.f32 %v1206_v33 }
 0x321   : > { %1477 = vrcp.f32 %v1046_v35  ;;  %v1047_v37 = vadd.f32 1.0, %v1456_v36 }
 0x322   : > { %v1458_v38 = vpop.eup %1457 }
 0x323   : > { %1479 = vrcp.f32 %v1047_v37  ;;  %v1048_v39 = vadd.f32 1.0, %v1458_v38 }
 0x324   : > { %v1460_v40 = vpop.eup %1459 }
 0x325   : > { %v1462_v41 = vpop.eup %1461  ;;  %1080 = vst.msk [vmem:[%s1810_s24 + $0x8] sm:$0xff] %vm1078_vm3, %v1460_v40  ;;  %1481 = vrcp.f32 %v1048_v39 }
 0x326   : > { %v1464_v42 = vpop.eup %1463  ;;  %v1049_v43 = vadd.f32 1.0, %v1462_v41 }
 0x327   : > { %v1050_v44 = vadd.f32 1.0, %v1464_v42 }
 0x328   : > { %v1466_v45 = vpop.eup %1465  ;;  %1483 = vrcp.f32 %v1049_v43 }
 0x329   : > { %v1468_v46 = vpop.eup %1467  ;;  %1082 = vst.msk [vmem:[%s1810_s24 + $0x18] sm:$0xff] %vm1078_vm3, %v1466_v45  ;;  %1485 = vrcp.f32 %v1050_v44 }
 0x32a   : > { %v1470_v47 = vpop.eup %1469  ;;  %1079 = vst.msk [vmem:[%s1810_s24] sm:$0xff] %vm1078_vm3, %v1468_v46 }
 0x32b   : > { %v1472_v48 = vpop.eup %1471  ;;  %v1051_v49 = vadd.f32 1.0, %v1470_v47 }
 0x32c   : > { %v1474_v50 = vpop.eup %1473  ;;  %v1052_v51 = vadd.f32 1.0, %v1472_v48 }
 0x32d   : > { %v1476_v52 = vpop.eup %1475  ;;  %1081 = vst.msk [vmem:[%s1810_s24 + $0x10] sm:$0xff] %vm1078_vm3, %v1474_v50  ;;  %1487 = vrcp.f32 %v1051_v49 }
 0x32e   : > { %v1478_v53 = vpop.eup %1477  ;;  %1489 = vrcp.f32 %v1052_v51  ;;  %v1053_v54 = vadd.f32 1.0, %v1476_v52 }
 0x32f   : > { %1083 = vst.msk [vmem:[%s1810_s24 + $0x20] sm:$0xff] %vm1078_vm3, %v1478_v53 }
 0x330   : > { %v1480_v55 = vpop.eup %1479  ;;  %1491 = vrcp.f32 %v1053_v54 }
 0x331   : > { %1084 = vst.msk [vmem:[%s1810_s24 + $0x28] sm:$0xff] %vm1078_vm3, %v1480_v55 }
 0x332   : > { %v1482_v56 = vpop.eup %1481 }
 0x333   : > { %1085 = vst.msk [vmem:[%s1810_s24 + $0x30] sm:$0xff] %vm1078_vm3, %v1482_v56 }
 0x335   : > { %v1484_v57 = vpop.eup %1483 }
 0x336   : > { %v1486_v58 = vpop.eup %1485  ;;  %1086 = vst.msk [vmem:[%s1810_s24 + $0x38] sm:$0xff] %vm1078_vm3, %v1484_v57 }
 0x337   : > { %1087 = vst.msk [vmem:[%s1810_s24 + $0x40] sm:$0xff] %vm1078_vm3, %v1486_v58 }
 0x33a   : > { %v1488_v60 = vpop.eup %1487 }
 0x33b   : > { %v1490_v61 = vpop.eup %1489  ;;  %1088 = vst.msk [vmem:[%s1810_s24 + $0x48] sm:$0xff] %vm1078_vm3, %v1488_v60 }
 0x33c   : > { %1089 = vst.msk [vmem:[%s1810_s24 + $0x50] sm:$0xff] %vm1078_vm3, %v1490_v61 }
 0x33d   : > { %v1492_v62 = vpop.eup %1491 }
 0x33e   : > { %1090 = vst.msk [vmem:[%s1810_s24 + $0x58] sm:$0xff] %vm1078_vm3, %v1492_v62 }
 0x33f PF: > { %s21_s11 = sadd.s32 1, %s1499_s11  }
 0x340   : > { %p18_p4 = scmp.ge.s32.totalorder %s21_s11, 5  }
 0x342   :  { %20 = sbr.rel (!%p18_p4) target bundleno = 3 (0x3), region = 86 }

</bundles_post_ra>
